<compile_context>
chip_gen: v7x
topology: tpu7x:2x2x1
jax: 0.10.0
libtpu: 0.0.40
codegen_flags: <defaults>
</compile_context>

<pallas_src>
import functools
import math

import jax
import jax.numpy as jnp
from jax.experimental import pallas as pl
from jax.experimental.pallas import tpu as pltpu


def _round_up(x, m):
    return ((x + m - 1) // m) * m


def _even_tile(d, cap, align):
    """Aligned tile size <= ~cap chosen by evenly splitting d.

    Bounds padding to < align per block (round-up-to-cap can nearly double
    the work when d is just above cap)."""
    d_al = _round_up(max(int(d), 1), align)
    if d_al <= cap:
        return d_al
    nblocks = math.ceil(d_al / cap)
    return _round_up(math.ceil(d_al / nblocks), align)


def _vmem_capacity_bytes():
    try:
        return int(pltpu.get_tpu_info().vmem_capacity_bytes)
    except Exception:
        return 64 * 1024 * 1024  # conservative (v7x per-core VMEM)


def _choose_tiles(M, K, N, in_itemsize):
    """MXU/lane-aligned tiles; reuse- and VMEM-budget driven."""
    sub = 8 if in_itemsize >= 4 else 16      # bf16 packs 2 rows per sublane
    skinny_m = M <= 64                       # GCN-style: weight stream dominates
    cap_mn = 1024                            # bigger output tile => more HBM reuse
    cap_k = (2048 if in_itemsize <= 2 else 1024) if skinny_m else 512

    tm = _even_tile(M, cap_mn, sub)
    tn = _even_tile(N, cap_mn, 128)
    tk = _even_tile(K, cap_k, 128)

    # If the whole (padded) problem fits in a single output tile, split N so a
    # second TensorCore (v7x megacore) has a parallel block to work on.
    if M <= tm and N <= tn and tn % 256 == 0:
        tn //= 2
    return tm, tn, tk


# ----------------------------------------------------------------------------
# Kernels: one (tm, tn) f32 output tile, reduced over grid axis 2 (K, which is
# the innermost, "arbitrary"/sequential axis).  The output tile is resident in
# VMEM across the K axis and doubles as the accumulator.
# ----------------------------------------------------------------------------
def _matmul_bias_kernel(x_ref, w_ref, b_ref, o_ref):
    k = pl.program_id(2)
    partial_ = jnp.dot(x_ref[...], w_ref[...], preferred_element_type=jnp.float32)

    @pl.when(k == 0)
    def _():
        # Seed directly with the first partial product + broadcast bias:
        # no zero-fill store and no extra load/add on the first K step.
        o_ref[...] = partial_ + b_ref[...]

    @pl.when(k > 0)
    def _():
        o_ref[...] += partial_


def _matmul_nobias_kernel(x_ref, w_ref, o_ref):
    k = pl.program_id(2)
    partial_ = jnp.dot(x_ref[...], w_ref[...], preferred_element_type=jnp.float32)

    @pl.when(k == 0)
    def _():
        o_ref[...] = partial_

    @pl.when(k > 0)
    def _():
        o_ref[...] += partial_


def _weight_spec(tk, tn, deep_buffer):
    """Weight BlockSpec; optionally 3-deep buffered (skinny-M weight stream)."""
    index_map = lambda i, j, k: (k, j)
    if deep_buffer and hasattr(pl, "Buffered"):
        try:
            return pl.BlockSpec((tk, tn), index_map, pipeline_mode=pl.Buffered(3))
        except TypeError:  # older BlockSpec without pipeline_mode
            pass
    return pl.BlockSpec((tk, tn), index_map)


def _matmul_padded(xp, wp, bp, M, N, *, tm, tn, tk):
    """xp: (Mp, Kp), wp: (Kp, Np) in the operand dtype; bp: (1, Np) f32 or None.
    Returns the (M, N) f32 result (padding sliced off)."""
    Mp, Kp = xp.shape
    Kp_w, Np = wp.shape
    assert Kp == Kp_w
    assert Mp % tm == 0 and Np % tn == 0 and Kp % tk == 0

    in_itemsize = jnp.dtype(xp.dtype).itemsize
    grid = (Mp // tm, Np // tn, Kp // tk)
    use_bias = bp is not None

    # Skinny-M: the kernel is essentially an HBM weight stream; a deeper weight
    # buffer hides per-step DMA latency when the stream is long enough.
    deep_w = (M <= 64) and (grid[1] * grid[2] >= 3)

    in_specs = [
        pl.BlockSpec((tm, tk), lambda i, j, k: (i, k)),   # x tile
        _weight_spec(tk, tn, deep_w),                     # weight tile
    ]
    operands = [xp, wp]
    if use_bias:
        in_specs.append(pl.BlockSpec((1, tn), lambda i, j, k: (0, j)))
        operands.append(bp)

    kernel = _matmul_bias_kernel if use_bias else _matmul_nobias_kernel

    # VMEM working set: pipelined input tiles + double-buffered resident f32
    # output tile (also the accumulator) + bias.
    w_bufs = 3 if deep_w else 2
    working = (2 * tm * tk + w_bufs * tk * tn) * in_itemsize + 2 * tm * tn * 4
    if use_bias:
        working += 2 * tn * 4
    vmem_cap = _vmem_capacity_bytes()
    vmem_limit = int(min(max(working * 3 // 2, 16 * 1024 * 1024),
                         (vmem_cap * 3) // 4))

    # Actual tiled HBM traffic: x re-read once per N tile, W once per M tile,
    # output written once.
    cost = pl.CostEstimate(
        flops=2 * Mp * Np * Kp,
        transcendentals=0,
        bytes_accessed=(in_itemsize * (Mp * Kp * grid[1] + Kp * Np * grid[0])
                        + 4 * Mp * Np
                        + (4 * Np * grid[0] if use_bias else 0)),
    )

    out = pl.pallas_call(
        kernel,
        out_shape=jax.ShapeDtypeStruct((Mp, Np), jnp.float32),
        grid_spec=pltpu.PrefetchScalarGridSpec(
            num_scalar_prefetch=0,
            grid=grid,
            in_specs=in_specs,
            out_specs=pl.BlockSpec((tm, tn), lambda i, j, k: (i, j)),
        ),
        compiler_params=pltpu.CompilerParams(
            dimension_semantics=("parallel", "parallel", "arbitrary"),
            vmem_limit_bytes=vmem_limit,
        ),
        cost_estimate=cost,
    )(*operands)

    if (Mp, Np) != (M, N):
        out = out[:M, :N]
    return out


def matmul(x, weight, bias=None, *, use_bf16_inputs=True, tm=None, tn=None, tk=None):
    """out = x @ weight (+ bias) via the Pallas kernel.

    use_bf16_inputs=True (default): operands are rounded to bf16 for the MXU
    (the native path on v5e/v6e/v7x); accumulation stays f32.  Pass False for
    full-f32 operands (slower: multi-pass MXU emulation)."""
    M, K = x.shape
    K2, N = weight.shape
    assert K == K2, "inner dimensions must match"

    in_dtype = jnp.bfloat16 if use_bf16_inputs else jnp.float32
    itemsize = jnp.dtype(in_dtype).itemsize
    tm_, tn_, tk_ = _choose_tiles(M, K, N, itemsize)
    tm = tm_ if tm is None else tm
    tn = tn_ if tn is None else tn
    tk = tk_ if tk is None else tk

    Mp, Kp, Np = _round_up(M, tm), _round_up(K, tk), _round_up(N, tn)

    xp = x if (Mp, Kp) == (M, K) else jnp.pad(x, ((0, Mp - M), (0, Kp - K)))
    wp = weight if (Kp, Np) == (K, N) else jnp.pad(weight, ((0, Kp - K), (0, Np - N)))
    xp = xp.astype(in_dtype)
    wp = wp.astype(in_dtype)

    bp = None
    if bias is not None:
        bp = bias.astype(jnp.float32)
        if Np != N:
            bp = jnp.pad(bp, (0, Np - N))
        bp = bp.reshape(1, Np)

    out = _matmul_padded(xp, wp, bp, M, N, tm=tm, tn=tn, tk=tk)
    # TODO(synk): for bf16 callers, emit the output in bf16 from the kernel
    # (f32 scratch accumulator + cast at the last K step) to halve HBM writes.
    if out.dtype != x.dtype:
        out = out.astype(x.dtype)
    return out


class MatMulPallas:
    """JAX/Pallas equivalent of the PyTorch MatMul module (forward pass only)."""

    def __init__(self, input_features, output_features, bias=True, *,
                 key, use_bf16_inputs=True):
        wkey, bkey = jax.random.split(key)
        self.input_features = input_features
        self.output_features = output_features
        # torch.randn equivalents (standard normal), deterministic via PRNGKey.
        self.weight = jax.random.normal(
            wkey, (input_features, output_features), dtype=jnp.float32)
        self.bias = (jax.random.normal(bkey, (output_features,), dtype=jnp.float32)
                     if bias else None)
        self.use_bf16_inputs = use_bf16_inputs
        self._in_dtype = jnp.bfloat16 if use_bf16_inputs else jnp.float32
        # (tk, tn) -> (padded+cast weight, padded f32 bias); the static weight's
        # pad/cast is hoisted out of the per-call hot path.
        self._packed = {}

    def _packed_params(self, tk, tn):
        packed = self._packed.get((tk, tn))
        if packed is None:
            K, N = self.weight.shape
            Kp, Np = _round_up(K, tk), _round_up(N, tn)
            wp = self.weight
            if (Kp, Np) != (K, N):
                wp = jnp.pad(wp, ((0, Kp - K), (0, Np - N)))
            wp = wp.astype(self._in_dtype)
            bp = None
            if self.bias is not None:
                bp = self.bias.astype(jnp.float32)
                if Np != N:
                    bp = jnp.pad(bp, (0, Np - N))
                bp = bp.reshape(1, Np)
            packed = (wp, bp)
            self._packed[(tk, tn)] = packed
        return packed

    def __call__(self, x):
        M, K = x.shape
        assert K == self.input_features
        N = self.output_features
        itemsize = jnp.dtype(self._in_dtype).itemsize
        tm, tn, tk = _choose_tiles(M, K, N, itemsize)
        wp, bp = self._packed_params(tk, tn)
        Kp = wp.shape[0]
        Mp = _round_up(M, tm)
        xp = x if (Mp, Kp) == (M, K) else jnp.pad(x, ((0, Mp - M), (0, Kp - K)))
        xp = xp.astype(self._in_dtype)
        out = _matmul_padded(xp, wp, bp, M, N, tm=tm, tn=tn, tk=tk)
        return out.astype(x.dtype) if out.dtype != x.dtype else out


if __name__ == "__main__":
    key = jax.random.PRNGKey(0)
    k_x, k_params, k_x2, k_w2 = jax.random.split(key, 4)

    # Small GCN-like shapes: 8 nodes, 32 input features, 64 output features.
    M, K, N = 8, 32, 64
    x = jax.random.normal(k_x, (M, K), dtype=jnp.float32)

    module = MatMulPallas(K, N, bias=True, key=k_params)
    out = jax.block_until_ready(module(x))
    assert out.shape == (M, N) and out.dtype == jnp.float32

    # Reference for the default bf16-operand / f32-accumulate path: round the
    # operands to bf16 exactly as the kernel does, then a HIGHEST-precision
    # dot -> products are identical, only accumulation order differs.
    def bf16_ref(a, b):
        return jnp.dot(a.astype(jnp.bfloat16).astype(jnp.float32),
                       b.astype(jnp.bfloat16).astype(jnp.float32),
                       precision=jax.lax.Precision.HIGHEST)

    ref = bf16_ref(x, module.weight) + module.bias
    assert jnp.allclose(out, ref, atol=1e-3, rtol=1e-3), "bias path mismatch"
    # Sanity check vs. the true f32 reference (bf16 operand rounding only).
    ref_f32 = jnp.dot(x, module.weight,
                      precision=jax.lax.Precision.HIGHEST) + module.bias
    assert jnp.allclose(out, ref_f32, atol=0.25, rtol=0.05), "bf16 path too far from f32"

    # Second call reuses the cached padded/cast weight (hot path only pads x).
    out_again = jax.block_until_ready(module(x))
    assert jnp.allclose(out, out_again)

    # Non-divisible shapes + no-bias + full-f32 operand path (exercises padding,
    # the bias-free kernel and the f32 fallback).
    M2, K2, N2 = 200, 96, 130
    x2 = jax.random.normal(k_x2, (M2, K2), dtype=jnp.float32)
    w2 = jax.random.normal(k_w2, (K2, N2), dtype=jnp.float32)
    out2 = jax.block_until_ready(matmul(x2, w2, None, use_bf16_inputs=False))
    ref2 = jnp.dot(x2, w2, precision=jax.lax.Precision.HIGHEST)
    assert out2.shape == (M2, N2)
    assert jnp.allclose(out2, ref2, atol=0.3, rtol=0.02), "no-bias f32 path mismatch"

    # Same shapes on the default bf16 path (tight vs. the bf16-rounded ref).
    out3 = jax.block_until_ready(matmul(x2, w2, None))
    ref3 = bf16_ref(x2, w2)
    assert jnp.allclose(out3, ref3, atol=2e-3, rtol=2e-3), "no-bias bf16 path mismatch"

    print("KERNEL_OK")
</pallas_src>

<mosaic_0001>
module attributes {stable_mosaic.version = 11 : i64} {
  func.func @_matmul_bias_kernel(%arg0: i32, %arg1: i32, %arg2: i32, %arg3: memref<16x128xbf16, #tpu.memory_space<vmem>>, %arg4: memref<128x128xbf16, #tpu.memory_space<vmem>>, %arg5: memref<1x128xf32, #tpu.memory_space<vmem>>, %arg6: memref<16x128xf32, #tpu.memory_space<vmem>>) attributes {dimension_semantics = [#tpu.dimension_semantics<parallel>, #tpu.dimension_semantics<parallel>, #tpu.dimension_semantics<arbitrary>], iteration_bounds = array<i64: 1, 1, 1>, scalar_prefetch = 0 : i64, scratch_operands = 0 : i64, tpu.core_type = #tpu.core_type<tc>, window_params = [{transform_indices = @transform_0, window_bounds = array<i64: 16, 128>}, {transform_indices = @transform_1, window_bounds = array<i64: 128, 128>}, {transform_indices = @transform_2, window_bounds = array<i64: 1, 128>}, {transform_indices = @transform_3, window_bounds = array<i64: 16, 128>}]} {
    %c0 = arith.constant 0 : index
    %c0_0 = arith.constant 0 : index
    %0 = vector.load %arg3[%c0, %c0_0] : memref<16x128xbf16, #tpu.memory_space<vmem>>, vector<16x128xbf16>
    %c0_1 = arith.constant 0 : index
    %c0_2 = arith.constant 0 : index
    %1 = vector.load %arg4[%c0_1, %c0_2] : memref<128x128xbf16, #tpu.memory_space<vmem>>, vector<128x128xbf16>
    %cst = arith.constant dense<0.000000e+00> : vector<16x128xf32>
    %2 = tpu.matmul %0, %1, %cst {dimension_numbers = #tpu.dot_dimension_numbers<[1], [0], [0], [1], [0, 0, 1, 1], [], []>} : vector<16x128xbf16>, vector<128x128xbf16>, vector<16x128xf32> -> vector<16x128xf32>
    %c0_i32 = arith.constant 0 : i32
    %3 = arith.cmpi eq, %arg2, %c0_i32 : i32
    %4 = arith.extui %3 : i1 to i32
    %c0_i32_3 = arith.constant 0 : i32
    %5 = arith.cmpi ne, %4, %c0_i32_3 : i32
    scf.if %5 {
      %c0_6 = arith.constant 0 : index
      %c0_7 = arith.constant 0 : index
      %9 = vector.load %arg5[%c0_6, %c0_7] : memref<1x128xf32, #tpu.memory_space<vmem>>, vector<1x128xf32>
      %10 = vector.broadcast %9 : vector<1x128xf32> to vector<16x128xf32>
      %11 = arith.addf %2, %10 : vector<16x128xf32>
      %c0_8 = arith.constant 0 : index
      %c0_9 = arith.constant 0 : index
      %12 = vector.load %arg6[%c0_8, %c0_9] : memref<16x128xf32, #tpu.memory_space<vmem>>, vector<16x128xf32>
      tpu.vector_store %arg6[%c0_8, %c0_9], %11 {strides = array<i32>} : memref<16x128xf32, #tpu.memory_space<vmem>>, vector<16x128xf32>,
    } else {
    }
    %c0_i32_4 = arith.constant 0 : i32
    %6 = arith.cmpi sgt, %arg2, %c0_i32_4 : i32
    %7 = arith.extui %6 : i1 to i32
    %c0_i32_5 = arith.constant 0 : i32
    %8 = arith.cmpi ne, %7, %c0_i32_5 : i32
    scf.if %8 {
      %c0_6 = arith.constant 0 : index
      %c0_7 = arith.constant 0 : index
      %9 = vector.load %arg6[%c0_6, %c0_7] : memref<16x128xf32, #tpu.memory_space<vmem>>, vector<16x128xf32>
      %10 = arith.addf %9, %2 : vector<16x128xf32>
      %c0_8 = arith.constant 0 : index
      %c0_9 = arith.constant 0 : index
      %11 = vector.load %arg6[%c0_8, %c0_9] : memref<16x128xf32, #tpu.memory_space<vmem>>, vector<16x128xf32>
      tpu.vector_store %arg6[%c0_8, %c0_9], %10 {strides = array<i32>} : memref<16x128xf32, #tpu.memory_space<vmem>>, vector<16x128xf32>,
    } else {
    }
    return
  }
  func.func @transform_0(%arg0: i32, %arg1: i32, %arg2: i32) -> (i32, i32) {
    %c0_i32 = arith.constant 0 : i32
    return %arg0, %arg2 : i32, i32
  }
  func.func @transform_1(%arg0: i32, %arg1: i32, %arg2: i32) -> (i32, i32) {
    %c0_i32 = arith.constant 0 : i32
    return %arg2, %arg1 : i32, i32
  }
  func.func @transform_2(%arg0: i32, %arg1: i32, %arg2: i32) -> (i32, i32) {
    %c0_i32 = arith.constant 0 : i32
    %c0_i32_0 = arith.constant 0 : i32
    return %c0_i32, %arg1 : i32, i32
  }
  func.func @transform_3(%arg0: i32, %arg1: i32, %arg2: i32) -> (i32, i32) {
    %c0_i32 = arith.constant 0 : i32
    return %arg0, %arg1 : i32, i32
  }
}

</mosaic_0001>

<bundles_post_ra>
// kernel: tpu_custom_call.1
= control target key start
LH: loop header
LB: loop body
LE: loop exit
PB: predicated region body
PF: predicated region fallthrough
CT: control target
= control target key end

     0   :  { %8 = vsyncpa [#allocation3], 0  ;;  %s397_s0 = inlined_call_operand.hbm [shape: bf16[16,128], index: 0, kind: input, shape index: {}]   ;;  %s398_s1 = inlined_call_operand.hbm [shape: bf16[128,128], index: 1, kind: input, shape index: {}]   ;;  %s399_s2 = inlined_call_operand.vmem [shape: f32[1,128], index: 2, kind: input, shape index: {}]   ;;  %s400_s3 = inlined_call_operand.hbm [shape: f32[16,128], index: 3, kind: output, shape index: {}]  }
   0x1   :  { %9 = vsyncpa [#allocation6], 0 }
   0x2   :  { %10 = vsyncpa [#allocation4], 0  ;;  %s329_s12 = smov [#allocation2]   ;;  %s257_s16 = scalar_lea.hbm %s397_s0, 128 }
   0x3   :  { %s16_s13 = sshll.u32 %s329_s12, 4  ;;  %p258_p0 = scmp.ne.s32.totalorder %s397_s0, %s257_s16  ;;  %s17_s13 = int_to_ptr.vmem [resolvable:$true] %s16_s13 }
   0x4   :  { %p261_p1 = scmp.lt.u32.totalorder %s257_s16, %s397_s0 }
   0x6   :  { %p263_p2 = pnand %p261_p1, %p258_p0 }
   0x8   :  { %266 = shalt.err (!%p263_p2)
}
   0x9   :  { %s267_s21 = scalar_lea.vmem %s17_s13, 128  ;;  %p272_p4 = scmp.lt.s32.totalorder %s17_s13, %s17_s13 }
   0xa   :  { %p268_p3 = scmp.ne.s32.totalorder %s17_s13, %s267_s21  ;;  %p273_p5 = scmp.lt.s32.totalorder %s267_s21, %s267_s21 }
   0xc   :  { %p274_p6 = por %p273_p5, %p272_p4 }
   0xe   :  { %p275_p7 = pnand %p274_p6, %p268_p3 }
  0x10   :  { %278 = shalt.err (!%p275_p7)
}
  0x11   :  { %s330_s22 = smov 64   ;;  %s331_s23 = smov 4  }
  0x12   :  { %22 = dma.hbm_to_vmem [thread:$0]  %s397_s0, 128, %s17_s13, [#allocation3], %s330_s22, %s330_s22, %s331_s23  }
  0x13   :  { %s332_s26 = smov [#allocation5]   ;;  %s279_s30 = scalar_lea.hbm %s398_s1, 1024 }
  0x14   :  { %s28_s27 = sshll.u32 %s332_s26, 4  ;;  %p280_p8 = scmp.ne.s32.totalorder %s398_s1, %s279_s30  ;;  %s29_s27 = int_to_ptr.vmem [resolvable:$true] %s28_s27 }
  0x15   :  { %p283_p9 = scmp.lt.u32.totalorder %s279_s30, %s398_s1 }
  0x17   :  { %p285_p10 = pnand %p283_p9, %p280_p8 }
  0x19   :  { %288 = shalt.err (!%p285_p10)
}
  0x1a   :  { %s289_s8 = scalar_lea.vmem %s29_s27, 1024  ;;  %p294_p12 = scmp.lt.s32.totalorder %s29_s27, %s29_s27 }
  0x1b   :  { %p290_p11 = scmp.ne.s32.totalorder %s29_s27, %s289_s8  ;;  %p295_p13 = scmp.lt.s32.totalorder %s289_s8, %s289_s8 }
  0x1d   :  { %p296_p0 = por %p295_p13, %p294_p12 }
  0x1f   :  { %p297_p1 = pnand %p296_p0, %p290_p11 }
  0x21   :  { %300 = shalt.err (!%p297_p1)
}
  0x22   :  { %34 = dma.hbm_to_vmem [thread:$0]  %s398_s1, 1024, %s29_s27, [#allocation6], %s330_s22, %s330_s22, %s331_s23  }
  0x23   :  { %323 = dma.done.wait [#allocation3], 128  }
  0x24   :  { %324 = vsyncadd [#allocation3], 4294967168 }
  0x25   :  { %325 = dma.done.wait [#allocation6], 1024  }
  0x26   :  { %326 = vsyncadd [#allocation6], 4294966272  ;;  %v333_v0 = vmov 0.0   ;;  %vm334_vm0 = vmmov 0   ;;  %v248_v1 = vld [vmem:[#allocation5] sm:$0xff]   ;;  %v249_v2 = vld [vmem:[#allocation5 + $0x8] sm:$0xff]  }
  0x27   :  { %219 = vmatprep.subr.bf16.mxu0 %v333_v0  ;;  %235 = vmatprep.mubr.msk.bf16.mxu0 %vm334_vm0, %v333_v0  ;;  %v250_v3 = vld [vmem:[#allocation5 + $0x10] sm:$0xff]   ;;  %v251_v4 = vld [vmem:[#allocation5 + $0x18] sm:$0xff]   ;;  %v252_v5 = vld [vmem:[#allocation5 + $0x20] sm:$0xff]   ;;  %s335_s11 = smov [#allocation7]  }
  0x28   :  { %220 = vmatpush3.bf16.msra.mxu0 %v248_v1  ;;  %v253_v6 = vld [vmem:[#allocation5 + $0x28] sm:$0xff]   ;;  %v254_v7 = vld [vmem:[#allocation5 + $0x30] sm:$0xff]   ;;  %v255_v8 = vld [vmem:[#allocation5 + $0x38] sm:$0xff]   ;;  %s187_s12 = sshll.u32 %s335_s11, 4  ;;  %s188_s12 = int_to_ptr.vmem [resolvable:$true] %s187_s12 }
  0x29   :  { %221 = vmatprep.subr.bf16.mxu0 %v333_v0  ;;  %v256_v9 = vld [vmem:[#allocation2] sm:$0xff]   ;;  %s301_s13 = scalar_lea.vmem %s188_s12, 256  ;;  %p306_p3 = scmp.lt.s32.totalorder %s188_s12, %s188_s12 }
  0x2a   :  { %v209_v10 = vld [vmem:[%s399_s2] ss:$0 sm:$0xff]  ;;  %p302_p2 = scmp.ne.s32.totalorder %s188_s12, %s301_s13  ;;  %p307_p4 = scmp.lt.s32.totalorder %s301_s13, %s301_s13 }
  0x2c   :  { %222 = vmatpush3.bf16.msra.mxu0 %v249_v2  ;;  %p308_p5 = por %p307_p4, %p306_p3 }
  0x2d   :  { %223 = vmatprep.subr.bf16.mxu0 %v333_v0 }
  0x2e   :  { %p309_p6 = pnand %p308_p5, %p302_p2 }
  0x30   :  { %224 = vmatpush3.bf16.msra.mxu0 %v250_v3 }
  0x31   :  { %225 = vmatprep.subr.bf16.mxu0 %v333_v0 }
  0x34   :  { %226 = vmatpush3.bf16.msra.mxu0 %v251_v4 }
  0x35   :  { %227 = vmatprep.subr.bf16.mxu0 %v333_v0 }
  0x38   :  { %228 = vmatpush3.bf16.msra.mxu0 %v252_v5 }
  0x39   :  { %229 = vmatprep.subr.bf16.mxu0 %v333_v0 }
  0x3c   :  { %230 = vmatpush3.bf16.msra.mxu0 %v253_v6 }
  0x3d   :  { %231 = vmatprep.subr.bf16.mxu0 %v333_v0 }
  0x40   :  { %232 = vmatpush3.bf16.msra.mxu0 %v254_v7 }
  0x41   :  { %233 = vmatprep.subr.bf16.mxu0 %v333_v0 }
  0x44   :  { %234 = vmatpush3.bf16.msra.mxu0 %v255_v8 }
  0x47   :  { %236 = vmatmul.mubr.bf16.vlgmr.msra.gmra.mrb[0].mxu0 %v256_v9 }
 0x11a   :  { %v150_v11 = vpop.f32.mrb[0].mxu0 }
 0x11b   :  { %v168_v12 = vadd.f32 %v209_v10, %v150_v11  ;;  %v237_v13 = vpop.f32.mrb[1].mxu0 }
 0x11c   :  { %v153_v14 = vpop.f32.mrb[2].mxu0 }
 0x11d   :  { %170 = vst [vmem:[#allocation7] sm:$0xff] %v168_v12  ;;  %v169_v15 = vadd.f32 %v209_v10, %v153_v14  ;;  %v238_v16 = vpop.f32.mrb[3].mxu0 }
 0x11f   :  { %171 = vst [vmem:[#allocation7 + $0x8] sm:$0xff] %v169_v15 }
 0x120   :  { %312 = shalt.err (!%p309_p6)
}
 0x121   :  { %s313_s15 = scalar_lea.hbm %s400_s3, 256 }
 0x122   :  { %p314_p7 = scmp.ne.s32.totalorder %s400_s3, %s313_s15  ;;  %p317_p8 = scmp.lt.u32.totalorder %s313_s15, %s400_s3 }
 0x124   :  { %p319_p9 = pnand %p317_p8, %p314_p7 }
 0x126   :  { %322 = shalt.err (!%p319_p9)
}
 0x127   :  { %s336_s20 = smov 128   ;;  %s337_s21 = smov 8  }
 0x128   :  { %193 = dma.vmem_to_hbm [thread:$0]  %s188_s12, 256, %s400_s3, [#allocation4], %s336_s20, %s336_s20, %s337_s21  }
 0x129   :  { %327 = dma.done.wait [#allocation4], 256  }
 0x12a   :  { %328 = vsyncadd [#allocation4], 4294967040 }
 0x12b   :  { %197 = vsyncpa [#allocation3], 1 }
 0x12c   :  { %198 = vsyncpa [#allocation6], 1 }
 0x12d   :  { %199 = vsyncpa [#allocation4], 1 }

</bundles_post_ra>
